<compile_context>
chip_gen: v7x
topology: tpu7x:2x2x1
jax: 0.10.0
libtpu: 0.0.40
codegen_flags: <defaults>
</compile_context>

<pallas_src>
import jax
import jax.numpy as jnp
import numpy as np
from jax.experimental import pallas as pl
from jax.experimental.pallas import tpu as pltpu

_SUBLANE = 8
_LANE = 128


def _round_up(x, m):
    return ((x + m - 1) // m) * m


# ----------------------------- kernel ----------------------------------------
def write_unit_kernel(scalars_ref,     # SMEM (2,) f32: [b_attn, b_ctrl]
                      memories_ref,    # [M, TB, Dp]   io dtype (f32 or bf16)
                      controls_ref,    # [M+1, TB, Dp] io dtype
                      retrieved_ref,   # [TB, Dp]      io dtype
                      w_stk_ref,       # [3, Dp, Dp]   io dtype: W_ret, W_prev, W_mem
                      params_ref,      # [8, Dp] f32: row0=w_attn, row1=w_ctrl,
                                       #              row2=b_concat+b_mem
                      out_ref):        # [TB, Dp] f32
    f32 = jnp.float32
    M = memories_ref.shape[0]
    C = controls_ref.shape[0]          # == M + 1

    b_attn = scalars_ref[0]
    b_ctrl = scalars_ref[1]

    wa = params_ref[0:1, :]            # [1, Dp]
    wg = params_ref[1:2, :]            # [1, Dp]
    b_cm = params_ref[2:3, :]          # [1, Dp]  (b_concat + b_mem)

    prev_mem = memories_ref[M - 1].astype(f32)       # [TB, Dp]
    last_ctrl = controls_ref[C - 1].astype(f32)      # [TB, Dp]

    # ---- self-attention over the M previous controls -------------------------
    # w_attn is folded into the last control once; logits are lane-reduced
    # [TB, 1] columns (no [M, TB, 1] 3-D temp).  b_attn is constant across the
    # softmax axis (kept for fidelity; it cancels exactly).
    scaled_ctrl = last_ctrl * wa                     # [TB, Dp]
    logits = []
    for m in range(M):                               # M is small & static: unrolled
        lg = jnp.sum(controls_ref[m].astype(f32) * scaled_ctrl,
                     axis=1, keepdims=True) + b_attn # [TB, 1]
        logits.append(lg)

    m_max = logits[0]
    for m in range(1, M):
        m_max = jnp.maximum(m_max, logits[m])
    ps = [jnp.exp(lg - m_max) for lg in logits]      # [TB, 1] each (EUP exp)
    denom = ps[0]
    for m in range(1, M):
        denom = denom + ps[m]
    inv = pl.reciprocal(denom, approx=True)          # softmax norm on the EUP

    attn_mem = (ps[0] * inv) * memories_ref[0].astype(f32)        # [TB, Dp]
    for m in range(1, M):
        attn_mem = attn_mem + (ps[m] * inv) * memories_ref[m].astype(f32)

    # ---- concat-Linear + mem-Linear as three accumulating MXU dots -----------
    # next_mem = retrieved@W_ret + prev_mem@W_prev + attn_mem@W_mem + (bc + bm)
    acc = jnp.dot(retrieved_ref[...], w_stk_ref[0], preferred_element_type=f32)
    acc = acc + jnp.dot(memories_ref[M - 1], w_stk_ref[1],
                        preferred_element_type=f32)
    acc = acc + jnp.dot(attn_mem.astype(w_stk_ref.dtype), w_stk_ref[2],
                        preferred_element_type=f32)
    next_mem = acc + b_cm                            # [TB, Dp]

    # ---- memory gate ----------------------------------------------------------
    gate_logit = jnp.sum(last_ctrl * wg, axis=1, keepdims=True) + b_ctrl  # [TB,1]
    gate = jax.nn.sigmoid(gate_logit)
    out_ref[...] = (gate * prev_mem + (1.0 - gate) * next_mem).astype(out_ref.dtype)


# --------------------------- host-side packing --------------------------------
def prepare_write_unit_params(full, D, io_dtype=jnp.float32):
    """Pack/pad torch-style parameters into the kernel's lane-dense layout.

    full: dict with w_concat [2D,D], b_concat [D], w_attn [D,1], b_attn [1],
          w_mem [D,D], b_mem [D], w_ctrl [D,1], b_ctrl [1]  in math layout
          (y = x @ W + b, i.e. torch weight transposed).
    """
    Dp = _round_up(D, _LANE)
    w_concat = jnp.asarray(full["w_concat"], jnp.float32)
    w_mem = jnp.asarray(full["w_mem"], jnp.float32)

    # stacked weight slabs: [0]=retrieved half, [1]=prev_mem half, [2]=mem linear
    w_stk = jnp.zeros((3, Dp, Dp), jnp.float32)
    w_stk = w_stk.at[0, 0:D, 0:D].set(w_concat[0:D])
    w_stk = w_stk.at[1, 0:D, 0:D].set(w_concat[D:2 * D])
    w_stk = w_stk.at[2, 0:D, 0:D].set(w_mem)

    # merged param tile: one (8, Dp) VMEM tile instead of three (1, Dp) inputs
    params = jnp.zeros((_SUBLANE, Dp), jnp.float32)
    params = params.at[0, 0:D].set(jnp.asarray(full["w_attn"]).reshape(-1))
    params = params.at[1, 0:D].set(jnp.asarray(full["w_ctrl"]).reshape(-1))
    params = params.at[2, 0:D].set(jnp.asarray(full["b_concat"])
                                   + jnp.asarray(full["b_mem"]))

    scalars = jnp.array([full["b_attn"][0], full["b_ctrl"][0]], jnp.float32)
    return dict(w_stk=w_stk.astype(io_dtype), params=params, scalars=scalars)


# ------------------------------ wrapper ---------------------------------------
def write_unit_pallas(memories, controls, retrieved, packed, *, batch_tile=None):
    """memories: [M, B, D], controls: [M+1, B, D], retrieved: [B, D] -> [B, D]."""
    M, B, D = memories.shape
    C = controls.shape[0]
    assert C == M + 1, "WriteUnit expects len(controls) == len(memories) + 1"

    io_dtype = packed["w_stk"].dtype
    Dp = packed["w_stk"].shape[-1]
    assert D <= Dp

    # batch tile: multiple of 8 sublanes; default capped at 256 so that
    # double-buffered input tiles stay within v7x's smaller VMEM at real sizes.
    if batch_tile is None:
        batch_tile = min(_round_up(max(B, _SUBLANE), _SUBLANE), 256)
    TB = _round_up(batch_tile, _SUBLANE)
    Bp = _round_up(max(B, TB), TB)
    nb = Bp // TB

    # lane-dense padding (batch -> sublane multiple of TB, hidden -> 128 lanes)
    memories_p = jnp.pad(memories, ((0, 0), (0, Bp - B), (0, Dp - D))).astype(io_dtype)
    controls_p = jnp.pad(controls, ((0, 0), (0, Bp - B), (0, Dp - D))).astype(io_dtype)
    retrieved_p = jnp.pad(retrieved, ((0, Bp - B), (0, Dp - D))).astype(io_dtype)

    io_bytes = jnp.dtype(io_dtype).itemsize
    blk_in = (M * TB * Dp + C * TB * Dp + TB * Dp) * io_bytes
    blk_out = TB * Dp * 4
    w_bytes = 3 * Dp * Dp * io_bytes + _SUBLANE * Dp * 4
    vmem_limit = int(2 * (blk_in + blk_out) + 2 * w_bytes + (2 << 20))
    vmem_limit = min(max(vmem_limit, 16 << 20), 64 << 20)

    total_bytes = ((memories_p.size + controls_p.size + retrieved_p.size) * io_bytes
                   + 3 * Dp * Dp * io_bytes + _SUBLANE * Dp * 4 + 8
                   + Bp * Dp * 4)
    cost = pl.CostEstimate(
        flops=int(2 * Bp * 3 * Dp * Dp + 6 * M * Bp * Dp + 4 * Bp * Dp),
        transcendentals=int(M * Bp + 2 * Bp),
        bytes_accessed=int(total_bytes),
    )

    smem = pl.BlockSpec(memory_space=pltpu.MemorySpace.SMEM)
    out_p = pl.pallas_call(
        write_unit_kernel,
        out_shape=jax.ShapeDtypeStruct((Bp, Dp), jnp.float32),
        grid=(nb,),
        in_specs=[
            smem,                                              # scalar biases
            pl.BlockSpec((M, TB, Dp), lambda i: (0, i, 0)),    # memories
            pl.BlockSpec((C, TB, Dp), lambda i: (0, i, 0)),    # controls
            pl.BlockSpec((TB, Dp), lambda i: (i, 0)),          # retrieved
            pl.BlockSpec((3, Dp, Dp), lambda i: (0, 0, 0)),    # stacked weights (resident)
            pl.BlockSpec((_SUBLANE, Dp), lambda i: (0, 0)),    # merged param tile (resident)
        ],
        out_specs=pl.BlockSpec((TB, Dp), lambda i: (i, 0)),
        compiler_params=pltpu.CompilerParams(
            dimension_semantics=("parallel",),
            vmem_limit_bytes=vmem_limit,
        ),
        cost_estimate=cost,
    )(packed["scalars"], memories_p, controls_p, retrieved_p,
      packed["w_stk"], packed["params"])
    return out_p[:B, :D]


# ---------------- pure-JAX reference (mirrors the torch module) ----------------
def write_unit_ref(memories_list, controls_list, retrieved, full):
    prev_mem = memories_list[-1]
    concat = (jnp.concatenate([retrieved, prev_mem], axis=1) @ full["w_concat"]
              + full["b_concat"])
    controls_cat = jnp.stack(controls_list[:-1], axis=2)                 # [B, D, M]
    attn = controls_list[-1][:, :, None] * controls_cat                  # [B, D, M]
    attn = jnp.transpose(attn, (0, 2, 1)) @ full["w_attn"] + full["b_attn"]  # [B, M, 1]
    attn = jax.nn.softmax(attn, axis=1)
    attn = jnp.transpose(attn, (0, 2, 1))                                # [B, 1, M]
    memories_cat = jnp.stack(memories_list, axis=2)                      # [B, D, M]
    attn_mem = jnp.sum(attn * memories_cat, axis=2)                      # [B, D]
    next_mem = attn_mem @ full["w_mem"] + full["b_mem"] + concat
    gate = jax.nn.sigmoid(controls_list[-1] @ full["w_ctrl"] + full["b_ctrl"])
    return gate * prev_mem + (1.0 - gate) * next_mem


def xavier_uniform(key, shape):
    fan_in, fan_out = shape
    bound = float(np.sqrt(6.0 / (fan_in + fan_out)))
    return jax.random.uniform(key, shape, jnp.float32, -bound, bound)


if __name__ == "__main__":
    D, M = 32, 3          # hidden dim, number of stored memories
    C = M + 1             # number of controls (controls[:-1] has M entries)

    key = jax.random.PRNGKey(0)
    (k_mem, k_ctrl, k_ret, k_wc, k_wa, k_wm, k_wg,
     k_mem2, k_ctrl2, k_ret2) = jax.random.split(key, 10)

    # parameters (xavier_uniform weights, zero biases, as in the module __init__)
    full = dict(
        w_concat=xavier_uniform(k_wc, (2 * D, D)),
        b_concat=jnp.zeros((D,), jnp.float32),
        w_attn=xavier_uniform(k_wa, (D, 1)),
        b_attn=jnp.zeros((1,), jnp.float32),
        w_mem=xavier_uniform(k_wm, (D, D)),
        b_mem=jnp.zeros((D,), jnp.float32),
        w_ctrl=xavier_uniform(k_wg, (D, 1)),
        b_ctrl=jnp.zeros((1,), jnp.float32),
    )

    run = jax.jit(write_unit_pallas, static_argnames=("batch_tile",))

    # ---- run 1: f32 storage, single batch tile (B=4 -> Bp=8, grid=(1,)) -------
    B1 = 4
    memories = jax.random.normal(k_mem, (M, B1, D), jnp.float32)
    controls = jax.random.normal(k_ctrl, (C, B1, D), jnp.float32)
    retrieved = jax.random.normal(k_ret, (B1, D), jnp.float32)
    packed_f32 = prepare_write_unit_params(full, D, io_dtype=jnp.float32)

    out1 = jax.block_until_ready(run(memories, controls, retrieved, packed_f32))
    ref1 = write_unit_ref(list(memories), list(controls), retrieved, full)
    assert out1.shape == (B1, D)
    # approx (EUP) reciprocal in the softmax denominator -> slightly relaxed tol
    assert jnp.allclose(out1, ref1, atol=1e-2, rtol=1e-2), "f32 kernel mismatch vs reference"

    # ---- run 2: bf16 storage / MXU inputs, multi-tile batch grid (B=20, TB=8) --
    B2 = 20
    memories2 = jax.random.normal(k_mem2, (M, B2, D), jnp.float32)
    controls2 = jax.random.normal(k_ctrl2, (C, B2, D), jnp.float32)
    retrieved2 = jax.random.normal(k_ret2, (B2, D), jnp.float32)
    packed_bf16 = prepare_write_unit_params(full, D, io_dtype=jnp.bfloat16)

    out2 = jax.block_until_ready(
        run(memories2, controls2, retrieved2, packed_bf16, batch_tile=8))
    ref2 = write_unit_ref(list(memories2), list(controls2), retrieved2, full)
    assert out2.shape == (B2, D)
    # bf16 storage + bf16 MXU operands -> ~1e-2 relative error expected
    assert jnp.allclose(out2, ref2, atol=1e-1, rtol=1e-1), "bf16 kernel mismatch vs reference"

    print("KERNEL_OK")
</pallas_src>

<mosaic_0001>
module attributes {stable_mosaic.version = 11 : i64} {
  func.func @write_unit_kernel(%arg0: i32, %arg1: memref<2xf32, #tpu.memory_space<smem>>, %arg2: memref<3x8x128xf32, #tpu.memory_space<vmem>>, %arg3: memref<4x8x128xf32, #tpu.memory_space<vmem>>, %arg4: memref<8x128xf32, #tpu.memory_space<vmem>>, %arg5: memref<3x128x128xf32, #tpu.memory_space<vmem>>, %arg6: memref<8x128xf32, #tpu.memory_space<vmem>>, %arg7: memref<8x128xf32, #tpu.memory_space<vmem>>) attributes {dimension_semantics = [#tpu.dimension_semantics<parallel>], iteration_bounds = array<i64: 1>, scalar_prefetch = 0 : i64, scratch_operands = 0 : i64, tpu.core_type = #tpu.core_type<tc>, window_params = [{transform_indices = @transform_0, window_bounds = array<i64: 2>}, {transform_indices = @transform_1, window_bounds = array<i64: 3, 8, 128>}, {transform_indices = @transform_2, window_bounds = array<i64: 4, 8, 128>}, {transform_indices = @transform_3, window_bounds = array<i64: 8, 128>}, {pipeline_mode = #tpu.pipeline_mode<synchronous>, transform_indices = @transform_4, window_bounds = array<i64: 3, 128, 128>}, {pipeline_mode = #tpu.pipeline_mode<synchronous>, transform_indices = @transform_5, window_bounds = array<i64: 8, 128>}, {transform_indices = @transform_6, window_bounds = array<i64: 8, 128>}]} {
    %c0 = arith.constant 0 : index
    %0 = memref.load %arg1[%c0] : memref<2xf32, #tpu.memory_space<smem>>
    %c1 = arith.constant 1 : index
    %1 = memref.load %arg1[%c1] : memref<2xf32, #tpu.memory_space<smem>>
    %c0_0 = arith.constant 0 : index
    %c0_1 = arith.constant 0 : index
    %2 = vector.load %arg6[%c0_0, %c0_1] : memref<8x128xf32, #tpu.memory_space<vmem>>, vector<1x128xf32>
    %c1_2 = arith.constant 1 : index
    %c0_3 = arith.constant 0 : index
    %3 = vector.load %arg6[%c1_2, %c0_3] : memref<8x128xf32, #tpu.memory_space<vmem>>, vector<1x128xf32>
    %c2 = arith.constant 2 : index
    %c0_4 = arith.constant 0 : index
    %4 = vector.load %arg6[%c2, %c0_4] : memref<8x128xf32, #tpu.memory_space<vmem>>, vector<1x128xf32>
    %c2_5 = arith.constant 2 : index
    %c0_6 = arith.constant 0 : index
    %c0_7 = arith.constant 0 : index
    %5 = vector.load %arg2[%c2_5, %c0_6, %c0_7] : memref<3x8x128xf32, #tpu.memory_space<vmem>>, vector<1x8x128xf32>
    %6 = vector.shape_cast %5 : vector<1x8x128xf32> to vector<8x128xf32>
    %c3 = arith.constant 3 : index
    %c0_8 = arith.constant 0 : index
    %c0_9 = arith.constant 0 : index
    %7 = vector.load %arg3[%c3, %c0_8, %c0_9] : memref<4x8x128xf32, #tpu.memory_space<vmem>>, vector<1x8x128xf32>
    %8 = vector.shape_cast %7 : vector<1x8x128xf32> to vector<8x128xf32>
    %9 = vector.broadcast %2 : vector<1x128xf32> to vector<8x128xf32>
    %10 = arith.mulf %8, %9 : vector<8x128xf32>
    %c0_10 = arith.constant 0 : index
    %c0_11 = arith.constant 0 : index
    %c0_12 = arith.constant 0 : index
    %11 = vector.load %arg3[%c0_10, %c0_11, %c0_12] : memref<4x8x128xf32, #tpu.memory_space<vmem>>, vector<1x8x128xf32>
    %12 = vector.shape_cast %11 : vector<1x8x128xf32> to vector<8x128xf32>
    %13 = arith.mulf %12, %10 : vector<8x128xf32>
    %cst = arith.constant dense<0.000000e+00> : vector<8xf32>
    %14 = vector.multi_reduction <add>, %13, %cst [1] : vector<8x128xf32> to vector<8xf32>
    %15 = vector.shape_cast %14 : vector<8xf32> to vector<8x1xf32>
    %16 = vector.broadcast %0 : f32 to vector<8x1xf32>
    %17 = arith.addf %15, %16 : vector<8x1xf32>
    %c1_13 = arith.constant 1 : index
    %c0_14 = arith.constant 0 : index
    %c0_15 = arith.constant 0 : index
    %18 = vector.load %arg3[%c1_13, %c0_14, %c0_15] : memref<4x8x128xf32, #tpu.memory_space<vmem>>, vector<1x8x128xf32>
    %19 = vector.shape_cast %18 : vector<1x8x128xf32> to vector<8x128xf32>
    %20 = arith.mulf %19, %10 : vector<8x128xf32>
    %cst_16 = arith.constant dense<0.000000e+00> : vector<8xf32>
    %21 = vector.multi_reduction <add>, %20, %cst_16 [1] : vector<8x128xf32> to vector<8xf32>
    %22 = vector.shape_cast %21 : vector<8xf32> to vector<8x1xf32>
    %23 = vector.broadcast %0 : f32 to vector<8x1xf32>
    %24 = arith.addf %22, %23 : vector<8x1xf32>
    %c2_17 = arith.constant 2 : index
    %c0_18 = arith.constant 0 : index
    %c0_19 = arith.constant 0 : index
    %25 = vector.load %arg3[%c2_17, %c0_18, %c0_19] : memref<4x8x128xf32, #tpu.memory_space<vmem>>, vector<1x8x128xf32>
    %26 = vector.shape_cast %25 : vector<1x8x128xf32> to vector<8x128xf32>
    %27 = arith.mulf %26, %10 : vector<8x128xf32>
    %cst_20 = arith.constant dense<0.000000e+00> : vector<8xf32>
    %28 = vector.multi_reduction <add>, %27, %cst_20 [1] : vector<8x128xf32> to vector<8xf32>
    %29 = vector.shape_cast %28 : vector<8xf32> to vector<8x1xf32>
    %30 = vector.broadcast %0 : f32 to vector<8x1xf32>
    %31 = arith.addf %29, %30 : vector<8x1xf32>
    %32 = arith.maximumf %17, %24 : vector<8x1xf32>
    %33 = arith.maximumf %32, %31 : vector<8x1xf32>
    %34 = arith.subf %17, %33 : vector<8x1xf32>
    %35 = math.exp %34 : vector<8x1xf32>
    %36 = arith.subf %24, %33 : vector<8x1xf32>
    %37 = math.exp %36 : vector<8x1xf32>
    %38 = arith.subf %31, %33 : vector<8x1xf32>
    %39 = math.exp %38 : vector<8x1xf32>
    %40 = arith.addf %35, %37 : vector<8x1xf32>
    %41 = arith.addf %40, %39 : vector<8x1xf32>
    %42 = tpu.reciprocal %41 {approx = true} : vector<8x1xf32> -> vector<8x1xf32>
    %43 = arith.mulf %35, %42 : vector<8x1xf32>
    %c0_21 = arith.constant 0 : index
    %c0_22 = arith.constant 0 : index
    %c0_23 = arith.constant 0 : index
    %44 = vector.load %arg2[%c0_21, %c0_22, %c0_23] : memref<3x8x128xf32, #tpu.memory_space<vmem>>, vector<1x8x128xf32>
    %45 = vector.shape_cast %44 : vector<1x8x128xf32> to vector<8x128xf32>
    %46 = vector.broadcast %43 : vector<8x1xf32> to vector<8x128xf32>
    %47 = arith.mulf %46, %45 : vector<8x128xf32>
    %48 = arith.mulf %37, %42 : vector<8x1xf32>
    %c1_24 = arith.constant 1 : index
    %c0_25 = arith.constant 0 : index
    %c0_26 = arith.constant 0 : index
    %49 = vector.load %arg2[%c1_24, %c0_25, %c0_26] : memref<3x8x128xf32, #tpu.memory_space<vmem>>, vector<1x8x128xf32>
    %50 = vector.shape_cast %49 : vector<1x8x128xf32> to vector<8x128xf32>
    %51 = vector.broadcast %48 : vector<8x1xf32> to vector<8x128xf32>
    %52 = arith.mulf %51, %50 : vector<8x128xf32>
    %53 = arith.addf %47, %52 : vector<8x128xf32>
    %54 = arith.mulf %39, %42 : vector<8x1xf32>
    %c2_27 = arith.constant 2 : index
    %c0_28 = arith.constant 0 : index
    %c0_29 = arith.constant 0 : index
    %55 = vector.load %arg2[%c2_27, %c0_28, %c0_29] : memref<3x8x128xf32, #tpu.memory_space<vmem>>, vector<1x8x128xf32>
    %56 = vector.shape_cast %55 : vector<1x8x128xf32> to vector<8x128xf32>
    %57 = vector.broadcast %54 : vector<8x1xf32> to vector<8x128xf32>
    %58 = arith.mulf %57, %56 : vector<8x128xf32>
    %59 = arith.addf %53, %58 : vector<8x128xf32>
    %c0_30 = arith.constant 0 : index
    %c0_31 = arith.constant 0 : index
    %60 = vector.load %arg4[%c0_30, %c0_31] : memref<8x128xf32, #tpu.memory_space<vmem>>, vector<8x128xf32>
    %c0_32 = arith.constant 0 : index
    %c0_33 = arith.constant 0 : index
    %c0_34 = arith.constant 0 : index
    %61 = vector.load %arg5[%c0_32, %c0_33, %c0_34] : memref<3x128x128xf32, #tpu.memory_space<vmem>>, vector<1x128x128xf32>
    %62 = vector.shape_cast %61 : vector<1x128x128xf32> to vector<128x128xf32>
    %cst_35 = arith.constant dense<0.000000e+00> : vector<8x128xf32>
    %63 = tpu.matmul %60, %62, %cst_35 {dimension_numbers = #tpu.dot_dimension_numbers<[1], [0], [0], [1], [0, 0, 1, 1], [], []>} : vector<8x128xf32>, vector<128x128xf32>, vector<8x128xf32> -> vector<8x128xf32>
    %c2_36 = arith.constant 2 : index
    %c0_37 = arith.constant 0 : index
    %c0_38 = arith.constant 0 : index
    %64 = vector.load %arg2[%c2_36, %c0_37, %c0_38] : memref<3x8x128xf32, #tpu.memory_space<vmem>>, vector<1x8x128xf32>
    %65 = vector.shape_cast %64 : vector<1x8x128xf32> to vector<8x128xf32>
    %c1_39 = arith.constant 1 : index
    %c0_40 = arith.constant 0 : index
    %c0_41 = arith.constant 0 : index
    %66 = vector.load %arg5[%c1_39, %c0_40, %c0_41] : memref<3x128x128xf32, #tpu.memory_space<vmem>>, vector<1x128x128xf32>
    %67 = vector.shape_cast %66 : vector<1x128x128xf32> to vector<128x128xf32>
    %cst_42 = arith.constant dense<0.000000e+00> : vector<8x128xf32>
    %68 = tpu.matmul %65, %67, %cst_42 {dimension_numbers = #tpu.dot_dimension_numbers<[1], [0], [0], [1], [0, 0, 1, 1], [], []>} : vector<8x128xf32>, vector<128x128xf32>, vector<8x128xf32> -> vector<8x128xf32>
    %69 = arith.addf %63, %68 : vector<8x128xf32>
    %c2_43 = arith.constant 2 : index
    %c0_44 = arith.constant 0 : index
    %c0_45 = arith.constant 0 : index
    %70 = vector.load %arg5[%c2_43, %c0_44, %c0_45] : memref<3x128x128xf32, #tpu.memory_space<vmem>>, vector<1x128x128xf32>
    %71 = vector.shape_cast %70 : vector<1x128x128xf32> to vector<128x128xf32>
    %cst_46 = arith.constant dense<0.000000e+00> : vector<8x128xf32>
    %72 = tpu.matmul %59, %71, %cst_46 {dimension_numbers = #tpu.dot_dimension_numbers<[1], [0], [0], [1], [0, 0, 1, 1], [], []>} : vector<8x128xf32>, vector<128x128xf32>, vector<8x128xf32> -> vector<8x128xf32>
    %73 = arith.addf %69, %72 : vector<8x128xf32>
    %74 = vector.broadcast %4 : vector<1x128xf32> to vector<8x128xf32>
    %75 = arith.addf %73, %74 : vector<8x128xf32>
    %76 = vector.broadcast %3 : vector<1x128xf32> to vector<8x128xf32>
    %77 = arith.mulf %8, %76 : vector<8x128xf32>
    %cst_47 = arith.constant dense<0.000000e+00> : vector<8xf32>
    %78 = vector.multi_reduction <add>, %77, %cst_47 [1] : vector<8x128xf32> to vector<8xf32>
    %79 = vector.shape_cast %78 : vector<8xf32> to vector<8x1xf32>
    %80 = vector.broadcast %1 : f32 to vector<8x1xf32>
    %81 = arith.addf %79, %80 : vector<8x1xf32>
    %82 = arith.negf %81 : vector<8x1xf32>
    %83 = math.exp %82 : vector<8x1xf32>
    %cst_48 = arith.constant 1.000000e+00 : f32
    %84 = vector.broadcast %cst_48 : f32 to vector<8x1xf32>
    %85 = arith.addf %84, %83 : vector<8x1xf32>
    %86 = arith.divf %84, %85 : vector<8x1xf32>
    %87 = vector.broadcast %86 : vector<8x1xf32> to vector<8x128xf32>
    %88 = arith.mulf %87, %6 : vector<8x128xf32>
    %cst_49 = arith.constant 1.000000e+00 : f32
    %89 = vector.broadcast %cst_49 : f32 to vector<8x1xf32>
    %90 = arith.subf %89, %86 : vector<8x1xf32>
    %91 = vector.broadcast %90 : vector<8x1xf32> to vector<8x128xf32>
    %92 = arith.mulf %91, %75 : vector<8x128xf32>
    %93 = arith.addf %88, %92 : vector<8x128xf32>
    %c0_50 = arith.constant 0 : index
    %c0_51 = arith.constant 0 : index
    %94 = vector.load %arg7[%c0_50, %c0_51] : memref<8x128xf32, #tpu.memory_space<vmem>>, vector<8x128xf32>
    tpu.vector_store %arg7[%c0_50, %c0_51], %93 {strides = array<i32>} : memref<8x128xf32, #tpu.memory_space<vmem>>, vector<8x128xf32>,
    return
  }
  func.func @transform_0(%arg0: i32) -> i32 {
    %c0_i32 = arith.constant 0 : i32
    %c0_i32_0 = arith.constant 0 : i32
    return %c0_i32 : i32
  }
  func.func @transform_1(%arg0: i32) -> (i32, i32, i32) {
    %c0_i32 = arith.constant 0 : i32
    %c0_i32_0 = arith.constant 0 : i32
    %c0_i32_1 = arith.constant 0 : i32
    return %c0_i32, %arg0, %c0_i32_0 : i32, i32, i32
  }
  func.func @transform_2(%arg0: i32) -> (i32, i32, i32) {
    %c0_i32 = arith.constant 0 : i32
    %c0_i32_0 = arith.constant 0 : i32
    %c0_i32_1 = arith.constant 0 : i32
    return %c0_i32, %arg0, %c0_i32_0 : i32, i32, i32
  }
  func.func @transform_3(%arg0: i32) -> (i32, i32) {
    %c0_i32 = arith.constant 0 : i32
    %c0_i32_0 = arith.constant 0 : i32
    return %arg0, %c0_i32 : i32, i32
  }
  func.func @transform_4(%arg0: i32) -> (i32, i32, i32) {
    %c0_i32 = arith.constant 0 : i32
    %c0_i32_0 = arith.constant 0 : i32
    %c0_i32_1 = arith.constant 0 : i32
    %c0_i32_2 = arith.constant 0 : i32
    return %c0_i32, %c0_i32_0, %c0_i32_1 : i32, i32, i32
  }
  func.func @transform_5(%arg0: i32) -> (i32, i32) {
    %c0_i32 = arith.constant 0 : i32
    %c0_i32_0 = arith.constant 0 : i32
    %c0_i32_1 = arith.constant 0 : i32
    return %c0_i32, %c0_i32_0 : i32, i32
  }
  func.func @transform_6(%arg0: i32) -> (i32, i32) {
    %c0_i32 = arith.constant 0 : i32
    %c0_i32_0 = arith.constant 0 : i32
    return %arg0, %c0_i32 : i32, i32
  }
}

</mosaic_0001>

<bundles_post_ra>
// kernel: write_unit_pallas.1
= control target key start
LH: loop header
LB: loop body
LE: loop exit
PB: predicated region body
PF: predicated region fallthrough
CT: control target
= control target key end

     0   :  { %11 = vsyncpa [#allocation4], 0  ;;  %s821_s0 = inlined_call_operand.vmem [shape: f32[2], index: 0, kind: input, shape index: {}]   ;;  %s822_s1 = inlined_call_operand.vmem [shape: f32[3,8,128], index: 1, kind: input, shape index: {}]   ;;  %s823_s2 = inlined_call_operand.vmem [shape: f32[4,8,128], index: 2, kind: input, shape index: {}]   ;;  %s824_s3 = inlined_call_operand.vmem [shape: f32[8,128], index: 3, kind: input, shape index: {}]   ;;  %s825_s4 = inlined_call_operand.hbm [shape: f32[3,128,128], index: 4, kind: input, shape index: {}]   ;;  %s826_s5 = inlined_call_operand.vmem [shape: f32[8,128], index: 5, kind: input, shape index: {}]   ;;  %s827_s6 = inlined_call_operand.vmem [shape: f32[8,128], index: 6, kind: output, shape index: {}]  }
   0x1   :  { %s19_s23 = sshll.u32 %s821_s0, 4  ;;  %s20_s23 = int_to_ptr.vmem [resolvable:$true] %s19_s23 }
   0x2   :  { %12 = vsyncpa [#allocation3], 0  ;;  %s657_s24 = scalar_lea.vmem %s20_s23, 16  ;;  %p662_p1 = scmp.lt.s32.totalorder %s20_s23, %s20_s23 }
   0x3   :  { %p658_p0 = scmp.ne.s32.totalorder %s20_s23, %s657_s24  ;;  %p663_p2 = scmp.lt.s32.totalorder %s657_s24, %s657_s24 }
   0x5   :  { %p664_p3 = por %p663_p2, %p662_p1 }
   0x7   :  { %p665_p4 = pnand %p664_p3, %p658_p0 }
   0x9   :  { %668 = shalt.err (!%p665_p4)
}
   0xa   :  { %s695_s25 = smov [#allocation2]   ;;  %s696_s26 = smov [#allocation5]  }
   0xb   :  { %22 = dma.vmem_to_smem %s20_s23, 16, %s695_s25, [#allocation4]  }
   0xc   :  { %s34_s27 = sshll.u32 %s696_s26, 4  ;;  %s669_s30 = scalar_lea.hbm %s825_s4, 6144  ;;  %s35_s27 = int_to_ptr.vmem [resolvable:$true] %s34_s27 }
   0xd   :  { %p670_p5 = scmp.ne.s32.totalorder %s825_s4, %s669_s30  ;;  %p673_p6 = scmp.lt.u32.totalorder %s669_s30, %s825_s4 }
   0xf   :  { %p675_p7 = pnand %p673_p6, %p670_p5 }
  0x11   :  { %678 = shalt.err (!%p675_p7)
}
  0x12   :  { %s679_s10 = scalar_lea.vmem %s35_s27, 6144  ;;  %p684_p9 = scmp.lt.s32.totalorder %s35_s27, %s35_s27 }
  0x13   :  { %p680_p8 = scmp.ne.s32.totalorder %s35_s27, %s679_s10  ;;  %p685_p10 = scmp.lt.s32.totalorder %s679_s10, %s679_s10 }
  0x15   :  { %p686_p11 = por %p685_p10, %p684_p9 }
  0x17   :  { %p687_p12 = pnand %p686_p11, %p680_p8 }
  0x19   :  { %690 = shalt.err (!%p687_p12)
}
  0x1a   :  { %s697_s11 = smov 128   ;;  %s698_s12 = smov 8  }
  0x1b   :  { %40 = dma.hbm_to_vmem [thread:$0]  %s825_s4, 6144, %s35_s27, [#allocation3], %s697_s11, %s697_s11, %s698_s12  }
  0x1c   :  { %691 = dma.done.wait [#allocation4], 16  }
  0x1d   :  { %692 = vsyncadd [#allocation4], 4294967280 }
  0x1e   :  { %693 = dma.done.wait [#allocation3], 6144  }
  0x1f   :  { %694 = vsyncadd [#allocation3], 4294961152 }
  0x20   :  { %49 = sfence }
  0x21   :  { %v403_v0 = vld [vmem:[%s826_s5] ss:$0 sm:$0xff]  ;;  %v758_v1 = vld [vmem:[%s823_s2 + $0x18] sm:$0xff]  ;;  %v404_v4 = vld [vmem:[%s823_s2 + $0x8] sm:$0xff]  ;;  %v699_v6 = vmov 0.0|0.0   ;;  %vm700_vm0 = vmmov 0  }
  0x22   :  { %v64_v2 = vld [vmem:[%s823_s2] sm:$0xff]  ;;  %v63_v3 = vmul.f32 %v403_v0, %v758_v1  ;;  %v405_v5 = vld [vmem:[%s823_s2 + $0x10] sm:$0xff]  ;;  %566 = vmatprep.subr.bf16.mxu0 %v699_v6  ;;  %590 = vmatprep.subr.bf16.mxu1 %v699_v6  ;;  %v126_v8 = vld [vmem:[#allocation5 + $0x88] sm:$0xff]  ;;  %v701_v60 = vmov 0.0   ;;  %s50_s28 = sld [smem:[#allocation2]]  ;;  %s400_s8 = sld [smem:[#allocation2 + $0x1]] }
  0x23   :  { %v125_v7 = vld [vmem:[#allocation5 + $0x80] sm:$0xff]  ;;  %v109_v10 = vld [vmem:[#allocation5 + $0x8] sm:$0xff]  ;;  %v127_v14 = vld [vmem:[#allocation5 + $0x90] sm:$0xff]  ;;  %493 = vmatprep.mubr.msk.f32.mxu0 %vm700_vm0, %v701_v60  ;;  %528 = vmatprep.mubr.msk.f32.mxu1 %vm700_vm0, %v701_v60 }
  0x24   :  { %v108_v9 = vld [vmem:[#allocation5] sm:$0xff]  ;;  %v65_v11 = vmul.f32 %v64_v2, %v63_v3  ;;  %v78_v12 = vmul.f32 %v405_v5, %v63_v3  ;;  %v567_v13 = vpack.c.bf16 %v126_v8, %v125_v7  ;;  %v128_v15 = vld [vmem:[#allocation5 + $0x98] sm:$0xff]  ;;  %v110_v16 = vld [vmem:[#allocation5 + $0x10] sm:$0xff]  ;;  %v72_v19 = vmul.f32 %v404_v4, %v63_v3 }
  0x25   :  { %v591_v17 = vpack.c.bf16 %v109_v10, %v108_v9  ;;  %v111_v18 = vld [vmem:[#allocation5 + $0x18] sm:$0xff]  ;;  %v570_v20 = vpack.c.bf16 %v128_v15, %v127_v14  ;;  %v129_v22 = vld [vmem:[#allocation5 + $0xa0] sm:$0xff]  ;;  %v130_v23 = vld [vmem:[#allocation5 + $0xa8] sm:$0xff] }
  0x26   :  { %66 = vadd.xlane.f32.xlu0 %v65_v11  ;;  %79 = vadd.xlane.f32.xlu1 %v78_v12  ;;  %v594_v21 = vpack.c.bf16 %v111_v18, %v110_v16  ;;  %v112_v24 = vld [vmem:[#allocation5 + $0x20] sm:$0xff]  ;;  %v113_v25 = vld [vmem:[#allocation5 + $0x28] sm:$0xff]  ;;  %v573_v26 = vpack.c.bf16 %v130_v23, %v129_v22  ;;  %v131_v28 = vld [vmem:[#allocation5 + $0xb0] sm:$0xff] }
  0x27   :  { %568 = vmatpush3.bf16.msra.mxu0 %v567_v13  ;;  %592 = vmatpush3.bf16.msra.mxu1 %v591_v17  ;;  %v597_v27 = vpack.c.bf16 %v113_v25, %v112_v24  ;;  %v132_v29 = vld [vmem:[#allocation5 + $0xb8] sm:$0xff]  ;;  %v114_v30 = vld [vmem:[#allocation5 + $0x30] sm:$0xff]  ;;  %v133_v34 = vld [vmem:[#allocation5 + $0xc0] sm:$0xff] }
  0x28   :  { %569 = vmatprep.subr.bf16.mxu0 %v699_v6  ;;  %593 = vmatprep.subr.bf16.mxu1 %v699_v6  ;;  %v115_v31 = vld [vmem:[#allocation5 + $0x38] sm:$0xff]  ;;  %v576_v32 = vpack.c.bf16 %v132_v29, %v131_v28  ;;  %v134_v35 = vld [vmem:[#allocation5 + $0xc8] sm:$0xff]  ;;  %v116_v37 = vld [vmem:[#allocation5 + $0x40] sm:$0xff] }
  0x29   :  { %v600_v33 = vpack.c.bf16 %v115_v31, %v114_v30  ;;  %v579_v36 = vpack.c.bf16 %v134_v35, %v133_v34  ;;  %v117_v38 = vld [vmem:[#allocation5 + $0x48] sm:$0xff]  ;;  %v135_v40 = vld [vmem:[#allocation5 + $0xd0] sm:$0xff]  ;;  %v136_v41 = vld [vmem:[#allocation5 + $0xd8] sm:$0xff] }
  0x2a   :  { %73 = vadd.xlane.f32.xlu0 %v72_v19  ;;  %v603_v39 = vpack.c.bf16 %v117_v38, %v116_v37  ;;  %v582_v42 = vpack.c.bf16 %v136_v41, %v135_v40  ;;  %v118_v43 = vld [vmem:[#allocation5 + $0x50] sm:$0xff]  ;;  %v119_v44 = vld [vmem:[#allocation5 + $0x58] sm:$0xff]  ;;  %v137_v46 = vld [vmem:[#allocation5 + $0xe0] sm:$0xff] }
  0x2b   :  { %571 = vmatpush3.bf16.msra.mxu0 %v570_v20  ;;  %595 = vmatpush3.bf16.msra.mxu1 %v594_v21  ;;  %v606_v45 = vpack.c.bf16 %v119_v44, %v118_v43  ;;  %v138_v47 = vld [vmem:[#allocation5 + $0xe8] sm:$0xff]  ;;  %v120_v49 = vld [vmem:[#allocation5 + $0x60] sm:$0xff]  ;;  %v139_v52 = vld [vmem:[#allocation5 + $0xf0] sm:$0xff] }
  0x2c   :  { %572 = vmatprep.subr.bf16.mxu0 %v699_v6  ;;  %596 = vmatprep.subr.bf16.mxu1 %v699_v6  ;;  %v585_v48 = vpack.c.bf16 %v138_v47, %v137_v46  ;;  %v121_v50 = vld [vmem:[#allocation5 + $0x68] sm:$0xff]  ;;  %v140_v53 = vld [vmem:[#allocation5 + $0xf8] sm:$0xff]  ;;  %v122_v55 = vld [vmem:[#allocation5 + $0x70] sm:$0xff] }
  0x2d   :  { %v609_v51 = vpack.c.bf16 %v121_v50, %v120_v49  ;;  %v588_v54 = vpack.c.bf16 %v140_v53, %v139_v52  ;;  %v123_v56 = vld [vmem:[#allocation5 + $0x78] sm:$0xff]  ;;  %v282_v58 = vld [vmem:[#allocation5 + $0x100] sm:$0xff]  ;;  %v283_v59 = vld [vmem:[#allocation5 + $0x108] sm:$0xff] }
  0x2e   :  { %v612_v57 = vpack.c.bf16 %v123_v56, %v122_v55  ;;  %v790_v61 = vld [vmem:[%s822_s1 + $0x10] sm:$0xff]  ;;  %v615_v62 = vpack.c.bf16 %v283_v59, %v282_v58  ;;  %v107_v63 = vld [vmem:[%s824_s3] sm:$0xff]  ;;  %v285_v2 = vld [vmem:[#allocation5 + $0x118] sm:$0xff] }
  0x2f   :  { %574 = vmatpush3.bf16.msra.mxu0 %v573_v26  ;;  %598 = vmatpush3.bf16.msra.mxu1 %v597_v27  ;;  %v284_v0 = vld [vmem:[#allocation5 + $0x110] sm:$0xff]  ;;  %v286_v4 = vld [vmem:[#allocation5 + $0x120] sm:$0xff]  ;;  %v287_v5 = vld [vmem:[#allocation5 + $0x128] sm:$0xff]  ;;  %v68_v26 = vstv %s50_s28 }
  0x30   :  { %575 = vmatprep.subr.bf16.mxu0 %v699_v6  ;;  %599 = vmatprep.subr.bf16.mxu1 %v699_v6  ;;  %v618_v3 = vpack.c.bf16 %v285_v2, %v284_v0  ;;  %v621_v7 = vpack.c.bf16 %v287_v5, %v286_v4  ;;  %v288_v8 = vld [vmem:[#allocation5 + $0x130] sm:$0xff]  ;;  %v289_v9 = vld [vmem:[#allocation5 + $0x138] sm:$0xff]  ;;  %v290_v11 = vld [vmem:[#allocation5 + $0x140] sm:$0xff] }
  0x31   :  { %v624_v10 = vpack.c.bf16 %v289_v9, %v288_v8  ;;  %v291_v12 = vld [vmem:[#allocation5 + $0x148] sm:$0xff]  ;;  %v292_v14 = vld [vmem:[#allocation5 + $0x150] sm:$0xff]  ;;  %v293_v15 = vld [vmem:[#allocation5 + $0x158] sm:$0xff] }
  0x32   :  { %v627_v13 = vpack.c.bf16 %v291_v12, %v290_v11  ;;  %v630_v16 = vpack.c.bf16 %v293_v15, %v292_v14  ;;  %v294_v17 = vld [vmem:[#allocation5 + $0x160] sm:$0xff]  ;;  %v295_v18 = vld [vmem:[#allocation5 + $0x168] sm:$0xff]  ;;  %v296_v20 = vld [vmem:[#allocation5 + $0x170] sm:$0xff] }
  0x33   :  { %577 = vmatpush3.bf16.msra.mxu0 %v576_v32  ;;  %601 = vmatpush3.bf16.msra.mxu1 %v600_v33  ;;  %v633_v19 = vpack.c.bf16 %v295_v18, %v294_v17  ;;  %v297_v21 = vld [vmem:[#allocation5 + $0x178] sm:$0xff]  ;;  %v408_v23 = vld [vmem:[%s826_s5 + $0x1] ss:$0 sm:$0xff]  ;;  %v407_v4 = vld [vmem:[%s826_s5 + $0x2] ss:$0 sm:$0xff] }
  0x34   :  { %578 = vmatprep.subr.bf16.mxu0 %v699_v6  ;;  %602 = vmatprep.subr.bf16.mxu1 %v699_v6  ;;  %v636_v22 = vpack.c.bf16 %v297_v21, %v296_v20  ;;  %v378_v24 = vmul.f32 %v408_v23, %v758_v1  ;;  %v97_v44 = vld [vmem:[%s822_s1] sm:$0xff] }
  0x36   :  { %379 = vadd.xlane.f32.xlu1 %v378_v24 }
  0x37   :  { %580 = vmatpush3.bf16.msra.mxu0 %v579_v36  ;;  %604 = vmatpush3.bf16.msra.mxu1 %v603_v39 }
  0x38   :  { %581 = vmatprep.subr.bf16.mxu0 %v699_v6  ;;  %605 = vmatprep.subr.bf16.mxu1 %v699_v6 }
  0x3b   :  { %583 = vmatpush3.bf16.msra.mxu0 %v582_v42  ;;  %607 = vmatpush3.bf16.msra.mxu1 %v606_v45  ;;  %v406_v45 = vld [vmem:[%s822_s1 + $0x8] sm:$0xff] }
  0x3c   :  { %584 = vmatprep.subr.bf16.mxu0 %v699_v6  ;;  %608 = vmatprep.subr.bf16.mxu1 %v699_v6 }
  0x3f   :  { %586 = vmatpush3.bf16.msra.mxu0 %v585_v48  ;;  %610 = vmatpush3.bf16.msra.mxu1 %v609_v51 }
  0x40   :  { %587 = vmatprep.subr.bf16.mxu0 %v699_v6  ;;  %611 = vmatprep.subr.bf16.mxu1 %v699_v6 }
  0x43   :  { %589 = vmatpush3.bf16.msra.mxu0 %v588_v54  ;;  %613 = vmatpush3.bf16.msra.mxu1 %v612_v57 }
  0x44   :  { %614 = vmatprep.subr.bf16.mxu0 %v699_v6 }
  0x46   :  { %494 = vmatmul.mubr.f32.vlgmr.msra.gmra.mrb[0].mxu0 %v790_v61  ;;  %529 = vmatmul.mubr.f32.vlgmr.msra.gmra.mrb[0].mxu1 %v107_v63 }
  0x47   :  { %616 = vmatpush3.bf16.msra.mxu0 %v615_v62  ;;  %563 = vmatprep.mubr.msk.f32.mxu0 %vm700_vm0, %v701_v60  ;;  %v381_v60 = vstv %s400_s8 }
  0x48   :  { %617 = vmatprep.subr.bf16.mxu0 %v699_v6 }
  0x4b   :  { %619 = vmatpush3.bf16.msra.mxu0 %v618_v3 }
  0x4c   :  { %620 = vmatprep.subr.bf16.mxu0 %v699_v6 }
  0x4f   :  { %622 = vmatpush3.bf16.msra.mxu0 %v621_v7 }
  0x50   :  { %623 = vmatprep.subr.bf16.mxu0 %v699_v6 }
  0x53   :  { %625 = vmatpush3.bf16.msra.mxu0 %v624_v10 }
  0x54   :  { %626 = vmatprep.subr.bf16.mxu0 %v699_v6 }
  0x57   :  { %628 = vmatpush3.bf16.msra.mxu0 %v627_v13 }
  0x58   :  { %629 = vmatprep.subr.bf16.mxu0 %v699_v6 }
  0x5b   :  { %631 = vmatpush3.bf16.msra.mxu0 %v630_v16 }
  0x5c   :  { %632 = vmatprep.subr.bf16.mxu0 %v699_v6 }
  0x5f   :  { %634 = vmatpush3.bf16.msra.mxu0 %v633_v19 }
  0x60   :  { %635 = vmatprep.subr.bf16.mxu0 %v699_v6 }
  0x63   :  { %637 = vmatpush3.bf16.msra.mxu0 %v636_v22 }
  0xb3   :  { %v67_v25 = vpop.xlane.xlu0 %66  ;;  %v80_v27 = vpop.xlane.xlu1 %79 }
  0xb4   :  { %v69_v29 = vadd.f32 %v68_v26, %v67_v25  ;;  %v81_v31 = vadd.f32 %v80_v27, %v68_v26 }
  0xb7   :  { %v74_v28 = vpop.xlane.xlu0 %73 }
  0xb8   :  { %v75_v30 = vadd.f32 %v74_v28, %v68_v26 }
  0xba   :  { %v82_v6 = vmax.f32 %v69_v29, %v75_v30 }
  0xbc   :  { %v83_v32 = vmax.f32 %v82_v6, %v81_v31 }
  0xbe   :  { %v84_v33 = vsub.f32 %v69_v29, %v83_v32  ;;  %v87_v34 = vsub.f32 %v75_v30, %v83_v32  ;;  %v90_v35 = vsub.f32 %v81_v31, %v83_v32 }
  0xc0   :  { %v85_v36 = vmul.f32 1.442695, %v84_v33  ;;  %v88_v37 = vmul.f32 1.442695, %v87_v34  ;;  %v91_v38 = vmul.f32 1.442695, %v90_v35 }
  0xc2   :  { %645 = vpow2.f32 %v85_v36 }
  0xc3   :  { %647 = vpow2.f32 %v88_v37  ;;  %v380_v59 = vpop.xlane.xlu1 %379 }
  0xc4   :  { %649 = vpow2.f32 %v91_v38  ;;  %v382_v62 = vadd.f32 %v381_v60, %v380_v59 }
  0xc6   :  { %v409_v63 = vmul.f32 -1.442695, %v382_v62 }
  0xcc   :  { %v646_v1 = vpop.eup %645 }
  0xcd   :  { %v648_v39 = vpop.eup %647 }
  0xce   :  { %v93_v40 = vadd.f32 %v648_v39, %v646_v1  ;;  %v650_v41 = vpop.eup %649 }
  0xd0   :  { %v94_v42 = vadd.f32 %v650_v41, %v93_v40 }
  0xd2   :  { %651 = vrcp.f32 %v94_v42 }
  0xd3   :  { %653 = vpow2.f32 %v409_v63 }
  0xdc   :  { %v652_v43 = vpop.eup %651 }
  0xdd   :  { %v96_v46 = vmul.f32 %v652_v43, %v646_v1  ;;  %v99_v47 = vmul.f32 %v652_v43, %v648_v39  ;;  %v104_v48 = vmul.f32 %v652_v43, %v650_v41  ;;  %v654_v0 = vpop.eup %653 }
  0xde   :  { %v386_v2 = vadd.f32 1.0, %v654_v0 }
  0xdf   :  { %v98_v49 = vmul.f32 %v97_v44, %v96_v46  ;;  %v102_v50 = vmul.f32 %v406_v45, %v99_v47  ;;  %v105_v52 = vmul.f32 %v790_v61, %v104_v48 }
  0xe0   :  { %655 = vrcp.f32 %v386_v2 }
  0xe1   :  { %v103_v51 = vadd.f32 %v102_v50, %v98_v49 }
  0xe3   :  { %v106_v53 = vadd.f32 %v105_v52, %v103_v51 }
  0xe5   :  { %564 = vmatmul.mubr.f32.vlgmr.msra.gmra.mrb[2].mxu0 %v106_v53 }
  0xea   :  { %v656_v3 = vpop.eup %655 }
  0xeb   :  { %v390_v8 = vsub.f32 1.0, %v656_v3  ;;  %v389_v11 = vmul.f32 %v656_v3, %v790_v61 }
 0x119   :  { %v207_v54 = vpop.f32.mrb[0].mxu0  ;;  %v277_v56 = vpop.f32.mrb[0].mxu1 }
 0x11a   :  { %v495_v55 = vpop.f32.mrb[1].mxu0  ;;  %v278_v57 = vadd.f32 %v277_v56, %v207_v54  ;;  %v530_v58 = vpop.f32.mrb[1].mxu1 }
 0x1b8   :  { %v364_v5 = vpop.f32.mrb[2].mxu0 }
 0x1b9   :  { %v368_v7 = vadd.f32 %v364_v5, %v278_v57  ;;  %v565_v9 = vpop.f32.mrb[3].mxu0 }
 0x1bb   :  { %v373_v10 = vadd.f32 %v407_v4, %v368_v7 }
 0x1bd   :  { %v391_v12 = vmul.f32 %v390_v8, %v373_v10 }
 0x1bf   :  { %v392_v13 = vadd.f32 %v391_v12, %v389_v11 }
 0x1c1   :  { %393 = vst [vmem:[%s827_s6] sm:$0xff] %v392_v13 }
 0x1c2   :  { %398 = vsyncpa [#allocation3], 1 }
 0x1c3   :  { %399 = vsyncpa [#allocation4], 1 }

</bundles_post_ra>
